<compile_context>
chip_gen: v7x
topology: tpu7x:2x2x1
jax: 0.10.0
libtpu: 0.0.40
codegen_flags: <defaults>
</compile_context>

<pallas_src>
import jax
import jax.numpy as jnp
import numpy as np
from jax.experimental import pallas as pl
from jax.experimental.pallas import tpu as pltpu

K = 3             # ResidualBlock kernel_size
PAD = 1           # ResidualBlock padding
EPS = 1e-5        # nn.BatchNorm2d default eps
NEG_SLOPE = 0.01  # nn.LeakyReLU default negative_slope

# Images processed per grid step (static).  Keep N % BATCH_BLOCK == 0; raise for
# large N to amortize per-step overhead (and raise vmem_limit_bytes accordingly).
BATCH_BLOCK = 1

# MXU input dtype.  jnp.bfloat16 ~doubles MXU rate and halves VMEM traffic on
# v6e/v7x; kept f32 to match the PyTorch float32 forward numerics.
MXU_DTYPE = jnp.float32


# --------------------------------------------------------------------------
# Phase 1: fused DSConv2d #1 (pre-BN1) + per-step BN1 partial stats
# --------------------------------------------------------------------------
def _conv1_kernel(x_ref, w_ref, z1_ref, st_ref, xpad_s):
    # x_ref : (B, H, W*Cin)       lane-dense input images
    # w_ref : (K, W*Cin, W*Cout)  banded fused conv1 weights (h-taps + h-pad folded)
    # z1_ref: (B, H, W*Cout)      pre-BN conv1 output
    # st_ref: (1, 2, W*Cout)      per-step partial BN1 stats: [sum; sum of squares]
    # xpad_s: (H+2*PAD, W*Cin)    vertically padded VMEM scratch
    B, H, WCi = x_ref.shape
    WCo = w_ref.shape[2]

    # Zero only the PAD halo rows (two tiny stores); interior rewritten per image.
    zrow = jnp.zeros((PAD, WCi), jnp.float32)
    xpad_s[0:PAD, :] = zrow
    xpad_s[H + PAD:H + 2 * PAD, :] = zrow

    ssum = jnp.zeros((1, WCo), jnp.float32)
    ssq = jnp.zeros((1, WCo), jnp.float32)
    for b in range(B):                       # static unroll over the batch sub-block
        xpad_s[PAD:PAD + H, :] = x_ref[b]
        acc = jnp.zeros((H, WCo), jnp.float32)
        for kh in range(K):                  # K matmuls; output already lane-dense
            acc += jnp.dot(xpad_s[kh:kh + H, :].astype(MXU_DTYPE), w_ref[kh],
                           preferred_element_type=jnp.float32)
        z1_ref[b] = acc
        ssum = ssum + jnp.sum(acc, axis=0, keepdims=True)
        ssq = ssq + jnp.sum(acc * acc, axis=0, keepdims=True)

    st_ref[0] = jnp.concatenate([ssum, ssq], axis=0)   # (2, W*Cout), lane-dense


# --------------------------------------------------------------------------
# Phase 2: BN1 affine + LeakyReLU + fused DSConv2d #2 (pre-BN2) + BN2 partial stats
# --------------------------------------------------------------------------
def _conv2_kernel(z1_ref, sc_ref, sh_ref, w_ref, z2_ref, st_ref, apad_s):
    # z1_ref: (B, H, W*Cout)   sc_ref/sh_ref: (1, W*Cout) lane-tiled BN1 affine
    # w_ref : (K, W*Cout, W*Cout)   z2_ref: (B, H, W*Cout)   st_ref: (1, 2, W*Cout)
    # apad_s: (H+2*PAD, W*Cout)
    B, H, WCo = z1_ref.shape
    sc = sc_ref[...]
    sh = sh_ref[...]

    zrow = jnp.zeros((PAD, WCo), jnp.float32)
    apad_s[0:PAD, :] = zrow
    apad_s[H + PAD:H + 2 * PAD, :] = zrow

    ssum = jnp.zeros((1, WCo), jnp.float32)
    ssq = jnp.zeros((1, WCo), jnp.float32)
    for b in range(B):
        a = z1_ref[b] * sc + sh                       # BN1 affine (lane-dense VPU)
        a = jnp.where(a > 0, a, NEG_SLOPE * a)        # LeakyReLU
        apad_s[PAD:PAD + H, :] = a
        acc = jnp.zeros((H, WCo), jnp.float32)
        for kh in range(K):
            acc += jnp.dot(apad_s[kh:kh + H, :].astype(MXU_DTYPE), w_ref[kh],
                           preferred_element_type=jnp.float32)
        z2_ref[b] = acc
        ssum = ssum + jnp.sum(acc, axis=0, keepdims=True)
        ssq = ssq + jnp.sum(acc * acc, axis=0, keepdims=True)

    st_ref[0] = jnp.concatenate([ssum, ssq], axis=0)


# --------------------------------------------------------------------------
# Parameters (mirror PyTorch defaults); KxK weights stored as (K*K, Cin, Cmid)
# --------------------------------------------------------------------------
def init_params(key, cin, cout):
    ks = jax.random.split(key, 6)

    def conv_w(k, shape, fan_in):
        bound = 1.0 / (fan_in ** 0.5)
        return jax.random.uniform(k, shape, jnp.float32, -bound, bound)

    return dict(
        w1a=conv_w(ks[0], (K * K, cin, cin), cin * K * K),
        w1b=conv_w(ks[1], (cin, cout), cin),
        g1=jnp.ones((1, cout), jnp.float32),
        b1=jnp.zeros((1, cout), jnp.float32),
        w2a=conv_w(ks[2], (K * K, cout, cout), cout * K * K),
        w2b=conv_w(ks[3], (cout, cout), cout),
        g2=jnp.ones((1, cout), jnp.float32),
        b2=jnp.zeros((1, cout), jnp.float32),
        wsa=conv_w(ks[4], (cin, cin), cin),
        wsb=conv_w(ks[5], (cin, cout), cin),
    )


# --------------------------------------------------------------------------
# Wrapper
# --------------------------------------------------------------------------
@jax.jit
def residual_block(x_nchw, params):
    # NCHW (PyTorch) -> NHWC once (tiny; XLA fuses it).  TODO(synk): keep the
    # surrounding model NHWC to drop this and the final transpose entirely.
    x = jnp.transpose(x_nchw, (0, 2, 3, 1)).astype(jnp.float32)
    N, H, W, Cin = x.shape
    Cout = params["w1b"].shape[-1]
    WCi, WCo = W * Cin, W * Cout
    Hp = H + 2 * PAD
    npix = N * H * W
    BB = BATCH_BLOCK
    assert N % BB == 0
    G = N // BB

    hp = jax.lax.Precision.HIGHEST   # exact-ish f32 for trace-time weight algebra

    # ---- trace-time weight fusion: KxK conv ∘ 1x1 conv (exact algebra) ----
    w1f = jnp.einsum("tij,jo->tio", params["w1a"], params["w1b"],
                     precision=hp).reshape(K, K, Cin, Cout)
    w2f = jnp.einsum("tij,jo->tio", params["w2a"], params["w2b"],
                     precision=hp).reshape(K, K, Cout, Cout)
    wsf = jnp.dot(params["wsa"], params["wsb"], precision=hp)     # fused skip 1x1

    def banded(wf, ci, co):
        # Fold horizontal taps + horizontal zero padding into a banded
        # (W*ci, W*co) weight per vertical tap kh:
        #   wb[kh][w'*ci+i, w*co+o] = wf[kh, kw, i, o]  where kw = w' - w + PAD.
        # Scales as K*W^2*ci*co; fine at these channel/width counts.
        rows = []
        for kh in range(K):
            m = jnp.zeros((W, ci, W, co), jnp.float32)
            for kw in range(K):
                shift = jnp.eye(W, W, PAD - kw, dtype=jnp.float32)   # [w', w]
                m = m + jnp.einsum("ab,io->aibo", shift, wf[kh, kw], precision=hp)
            rows.append(m.reshape(W * ci, W * co))
        return jnp.stack(rows).astype(MXU_DTYPE)                    # (K, W*ci, W*co)

    wb1 = banded(w1f, Cin, Cout)
    wb2 = banded(w2f, Cout, Cout)

    x2d = x.reshape(N, H, WCi)   # lane-dense (channels folded into lanes)

    cp = pltpu.CompilerParams(dimension_semantics=("parallel",),
                              vmem_limit_bytes=32 * 1024 * 1024)

    # ---- phase 1: fused conv1 + BN1 partial stats, grid over batch blocks ----
    z1, st1 = pl.pallas_call(
        _conv1_kernel,
        grid=(G,),
        in_specs=[pl.BlockSpec((BB, H, WCi), lambda b: (b, 0, 0)),
                  pl.BlockSpec((K, WCi, WCo), lambda b: (0, 0, 0))],
        out_specs=[pl.BlockSpec((BB, H, WCo), lambda b: (b, 0, 0)),
                   pl.BlockSpec((1, 2, WCo), lambda b: (b, 0, 0))],
        out_shape=[jax.ShapeDtypeStruct((N, H, WCo), jnp.float32),
                   jax.ShapeDtypeStruct((G, 2, WCo), jnp.float32)],
        scratch_shapes=[pltpu.VMEM((Hp, WCi), jnp.float32)],
        compiler_params=cp,
    )(x2d, wb1)

    # finalize BN1 (tiny XLA glue): reduce over steps and the W positions
    tot1 = jnp.sum(st1, axis=0).reshape(2, W, Cout).sum(axis=1)   # (2, Cout)
    mu1 = tot1[0] / npix
    var1 = tot1[1] / npix - mu1 * mu1    # biased batch variance (training mode)
    sc1 = params["g1"][0] * jax.lax.rsqrt(var1 + EPS)
    sh1 = params["b1"][0] - mu1 * sc1
    sc1_t = jnp.tile(sc1, W).reshape(1, WCo)   # lane-tiled for the (H, W*Cout) layout
    sh1_t = jnp.tile(sh1, W).reshape(1, WCo)

    # ---- phase 2: BN1 affine + LeakyReLU + fused conv2 + BN2 partial stats ----
    z2, st2 = pl.pallas_call(
        _conv2_kernel,
        grid=(G,),
        in_specs=[pl.BlockSpec((BB, H, WCo), lambda b: (b, 0, 0)),
                  pl.BlockSpec((1, WCo), lambda b: (0, 0)),
                  pl.BlockSpec((1, WCo), lambda b: (0, 0)),
                  pl.BlockSpec((K, WCo, WCo), lambda b: (0, 0, 0))],
        out_specs=[pl.BlockSpec((BB, H, WCo), lambda b: (b, 0, 0)),
                   pl.BlockSpec((1, 2, WCo), lambda b: (b, 0, 0))],
        out_shape=[jax.ShapeDtypeStruct((N, H, WCo), jnp.float32),
                   jax.ShapeDtypeStruct((G, 2, WCo), jnp.float32)],
        scratch_shapes=[pltpu.VMEM((Hp, WCo), jnp.float32)],
        compiler_params=cp,
    )(z1, sc1_t, sh1_t, wb2)

    # finalize BN2
    tot2 = jnp.sum(st2, axis=0).reshape(2, W, Cout).sum(axis=1)
    mu2 = tot2[0] / npix
    var2 = tot2[1] / npix - mu2 * mu2
    sc2 = params["g2"][0] * jax.lax.rsqrt(var2 + EPS)
    sh2 = params["b2"][0] - mu2 * sc2

    # ---- fused XLA epilogue: skip 1x1 (from x) + BN2 affine + add + transpose ----
    skip = jnp.dot(x.reshape(N * H * W, Cin), wsf,
                   precision=hp).reshape(N, H, W, Cout)
    out = skip + z2.reshape(N, H, W, Cout) * sc2 + sh2
    return jnp.transpose(out, (0, 3, 1, 2))   # back to NCHW


# --------------------------------------------------------------------------
# Pure-JAX reference (matches the PyTorch module semantics) for a self-check
# --------------------------------------------------------------------------
def _ref_forward(x, params):
    hp = jax.lax.Precision.HIGHEST

    def conv(x, w_oihw, pad):
        return jax.lax.conv_general_dilated(
            x, w_oihw, window_strides=(1, 1), padding=[(pad, pad), (pad, pad)],
            dimension_numbers=("NCHW", "OIHW", "NCHW"), precision=hp)

    def dsconv(x, wa_tio, wb_mo, k, pad):
        ci = wa_tio.shape[1]
        wa = wa_tio.reshape(k, k, ci, -1).transpose(3, 2, 0, 1)   # (mid, in, kh, kw)
        wb = wb_mo.T[:, :, None, None]                            # (out, mid, 1, 1)
        return conv(conv(x, wa, pad), wb, 0)

    def bn(h, g, b):
        mu = h.mean(axis=(0, 2, 3), keepdims=True)
        var = ((h - mu) ** 2).mean(axis=(0, 2, 3), keepdims=True)
        return (h - mu) * jax.lax.rsqrt(var + EPS) * g.reshape(1, -1, 1, 1) \
            + b.reshape(1, -1, 1, 1)

    h = dsconv(x, params["w1a"], params["w1b"], K, PAD)
    h = bn(h, params["g1"][0], params["b1"][0])
    h = jnp.where(h > 0, h, NEG_SLOPE * h)
    h = dsconv(h, params["w2a"], params["w2b"], K, PAD)
    h = bn(h, params["g2"][0], params["b2"][0])
    wsa = params["wsa"].T[:, :, None, None]
    wsb = params["wsb"].T[:, :, None, None]
    skip = conv(conv(x, wsa, 0), wsb, 0)
    return skip + h


if __name__ == "__main__":
    key = jax.random.PRNGKey(0)
    kx, kp = jax.random.split(key)

    N, Cin, Cout, Hs, Ws = 2, 4, 8, 16, 16
    x = jax.random.normal(kx, (N, Cin, Hs, Ws), jnp.float32)   # NCHW, like PyTorch
    params = init_params(kp, Cin, Cout)

    y = residual_block(x, params)
    jax.block_until_ready(y)
    assert y.shape == (N, Cout, Hs, Ws) and y.dtype == jnp.float32

    y_ref = _ref_forward(x, params)
    np.testing.assert_allclose(np.asarray(y), np.asarray(y_ref), rtol=1e-2, atol=1e-3)

    print("KERNEL_OK")
</pallas_src>

<mosaic_0001>
module attributes {stable_mosaic.version = 11 : i64} {
  func.func @_conv1_kernel(%arg0: i32, %arg1: memref<1x16x64xf32, #tpu.memory_space<vmem>>, %arg2: memref<3x64x128xf32, #tpu.memory_space<vmem>>, %arg3: memref<1x16x128xf32, #tpu.memory_space<vmem>>, %arg4: memref<1x2x128xf32, #tpu.memory_space<vmem>>, %arg5: memref<18x64xf32, #tpu.memory_space<vmem>>) attributes {dimension_semantics = [#tpu.dimension_semantics<parallel>], iteration_bounds = array<i64: 2>, scalar_prefetch = 0 : i64, scratch_operands = 1 : i64, tpu.core_type = #tpu.core_type<tc>, window_params = [{transform_indices = @transform_0, window_bounds = array<i64: 1, 16, 64>}, {pipeline_mode = #tpu.pipeline_mode<synchronous>, transform_indices = @transform_1, window_bounds = array<i64: 3, 64, 128>}, {transform_indices = @transform_2, window_bounds = array<i64: 1, 16, 128>}, {transform_indices = @transform_3, window_bounds = array<i64: 1, 2, 128>}]} {
    %cst = arith.constant 0.000000e+00 : f32
    %0 = vector.broadcast %cst : f32 to vector<1x64xf32>
    %c0 = arith.constant 0 : index
    %c0_0 = arith.constant 0 : index
    %1 = vector.load %arg5[%c0, %c0_0] : memref<18x64xf32, #tpu.memory_space<vmem>>, vector<1x64xf32>
    tpu.vector_store %arg5[%c0, %c0_0], %0 {strides = array<i32>} : memref<18x64xf32, #tpu.memory_space<vmem>>, vector<1x64xf32>,
    %c17 = arith.constant 17 : index
    %c0_1 = arith.constant 0 : index
    %2 = vector.load %arg5[%c17, %c0_1] : memref<18x64xf32, #tpu.memory_space<vmem>>, vector<1x64xf32>
    tpu.vector_store %arg5[%c17, %c0_1], %0 {strides = array<i32>} : memref<18x64xf32, #tpu.memory_space<vmem>>, vector<1x64xf32>,
    %cst_2 = arith.constant 0.000000e+00 : f32
    %3 = vector.broadcast %cst_2 : f32 to vector<1x128xf32>
    %cst_3 = arith.constant 0.000000e+00 : f32
    %4 = vector.broadcast %cst_3 : f32 to vector<1x128xf32>
    %c0_4 = arith.constant 0 : index
    %c0_5 = arith.constant 0 : index
    %c0_6 = arith.constant 0 : index
    %5 = vector.load %arg1[%c0_4, %c0_5, %c0_6] : memref<1x16x64xf32, #tpu.memory_space<vmem>>, vector<1x16x64xf32>
    %6 = vector.shape_cast %5 : vector<1x16x64xf32> to vector<16x64xf32>
    %c1 = arith.constant 1 : index
    %c0_7 = arith.constant 0 : index
    %7 = vector.load %arg5[%c1, %c0_7] : memref<18x64xf32, #tpu.memory_space<vmem>>, vector<16x64xf32>
    tpu.vector_store %arg5[%c1, %c0_7], %6 {strides = array<i32>} : memref<18x64xf32, #tpu.memory_space<vmem>>, vector<16x64xf32>,
    %cst_8 = arith.constant 0.000000e+00 : f32
    %8 = vector.broadcast %cst_8 : f32 to vector<16x128xf32>
    %c0_9 = arith.constant 0 : index
    %c0_10 = arith.constant 0 : index
    %9 = vector.load %arg5[%c0_9, %c0_10] : memref<18x64xf32, #tpu.memory_space<vmem>>, vector<16x64xf32>
    %c0_11 = arith.constant 0 : index
    %c0_12 = arith.constant 0 : index
    %c0_13 = arith.constant 0 : index
    %10 = vector.load %arg2[%c0_11, %c0_12, %c0_13] : memref<3x64x128xf32, #tpu.memory_space<vmem>>, vector<1x64x128xf32>
    %11 = vector.shape_cast %10 : vector<1x64x128xf32> to vector<64x128xf32>
    %cst_14 = arith.constant dense<0.000000e+00> : vector<16x128xf32>
    %12 = tpu.matmul %9, %11, %cst_14 {dimension_numbers = #tpu.dot_dimension_numbers<[1], [0], [0], [1], [0, 0, 1, 1], [], []>} : vector<16x64xf32>, vector<64x128xf32>, vector<16x128xf32> -> vector<16x128xf32>
    %13 = arith.addf %8, %12 : vector<16x128xf32>
    %c1_15 = arith.constant 1 : index
    %c0_16 = arith.constant 0 : index
    %14 = vector.load %arg5[%c1_15, %c0_16] : memref<18x64xf32, #tpu.memory_space<vmem>>, vector<16x64xf32>
    %c1_17 = arith.constant 1 : index
    %c0_18 = arith.constant 0 : index
    %c0_19 = arith.constant 0 : index
    %15 = vector.load %arg2[%c1_17, %c0_18, %c0_19] : memref<3x64x128xf32, #tpu.memory_space<vmem>>, vector<1x64x128xf32>
    %16 = vector.shape_cast %15 : vector<1x64x128xf32> to vector<64x128xf32>
    %cst_20 = arith.constant dense<0.000000e+00> : vector<16x128xf32>
    %17 = tpu.matmul %14, %16, %cst_20 {dimension_numbers = #tpu.dot_dimension_numbers<[1], [0], [0], [1], [0, 0, 1, 1], [], []>} : vector<16x64xf32>, vector<64x128xf32>, vector<16x128xf32> -> vector<16x128xf32>
    %18 = arith.addf %13, %17 : vector<16x128xf32>
    %c2 = arith.constant 2 : index
    %c0_21 = arith.constant 0 : index
    %19 = vector.load %arg5[%c2, %c0_21] : memref<18x64xf32, #tpu.memory_space<vmem>>, vector<16x64xf32>
    %c2_22 = arith.constant 2 : index
    %c0_23 = arith.constant 0 : index
    %c0_24 = arith.constant 0 : index
    %20 = vector.load %arg2[%c2_22, %c0_23, %c0_24] : memref<3x64x128xf32, #tpu.memory_space<vmem>>, vector<1x64x128xf32>
    %21 = vector.shape_cast %20 : vector<1x64x128xf32> to vector<64x128xf32>
    %cst_25 = arith.constant dense<0.000000e+00> : vector<16x128xf32>
    %22 = tpu.matmul %19, %21, %cst_25 {dimension_numbers = #tpu.dot_dimension_numbers<[1], [0], [0], [1], [0, 0, 1, 1], [], []>} : vector<16x64xf32>, vector<64x128xf32>, vector<16x128xf32> -> vector<16x128xf32>
    %23 = arith.addf %18, %22 : vector<16x128xf32>
    %c0_26 = arith.constant 0 : index
    %c0_27 = arith.constant 0 : index
    %c0_28 = arith.constant 0 : index
    %24 = vector.load %arg3[%c0_26, %c0_27, %c0_28] : memref<1x16x128xf32, #tpu.memory_space<vmem>>, vector<1x16x128xf32>
    %25 = vector.shape_cast %24 : vector<1x16x128xf32> to vector<16x128xf32>
    %26 = vector.shape_cast %23 : vector<16x128xf32> to vector<1x16x128xf32>
    tpu.vector_store %arg3[%c0_26, %c0_27, %c0_28], %26 {strides = array<i32>} : memref<1x16x128xf32, #tpu.memory_space<vmem>>, vector<1x16x128xf32>,
    %cst_29 = arith.constant dense<0.000000e+00> : vector<128xf32>
    %27 = vector.multi_reduction <add>, %23, %cst_29 [0] : vector<16x128xf32> to vector<128xf32>
    %28 = vector.shape_cast %27 : vector<128xf32> to vector<1x128xf32>
    %29 = arith.addf %3, %28 : vector<1x128xf32>
    %30 = arith.mulf %23, %23 : vector<16x128xf32>
    %cst_30 = arith.constant dense<0.000000e+00> : vector<128xf32>
    %31 = vector.multi_reduction <add>, %30, %cst_30 [0] : vector<16x128xf32> to vector<128xf32>
    %32 = vector.shape_cast %31 : vector<128xf32> to vector<1x128xf32>
    %33 = arith.addf %4, %32 : vector<1x128xf32>
    %34 = tpu.concatenate %29, %33 in 0 : vector<1x128xf32>, vector<1x128xf32> -> vector<2x128xf32>
    %c0_31 = arith.constant 0 : index
    %c0_32 = arith.constant 0 : index
    %c0_33 = arith.constant 0 : index
    %35 = vector.load %arg4[%c0_31, %c0_32, %c0_33] : memref<1x2x128xf32, #tpu.memory_space<vmem>>, vector<1x2x128xf32>
    %36 = vector.shape_cast %35 : vector<1x2x128xf32> to vector<2x128xf32>
    %37 = vector.shape_cast %34 : vector<2x128xf32> to vector<1x2x128xf32>
    tpu.vector_store %arg4[%c0_31, %c0_32, %c0_33], %37 {strides = array<i32>} : memref<1x2x128xf32, #tpu.memory_space<vmem>>, vector<1x2x128xf32>,
    return
  }
  func.func @transform_0(%arg0: i32) -> (i32, i32, i32) {
    %c0_i32 = arith.constant 0 : i32
    %c0_i32_0 = arith.constant 0 : i32
    %c0_i32_1 = arith.constant 0 : i32
    return %arg0, %c0_i32, %c0_i32_0 : i32, i32, i32
  }
  func.func @transform_1(%arg0: i32) -> (i32, i32, i32) {
    %c0_i32 = arith.constant 0 : i32
    %c0_i32_0 = arith.constant 0 : i32
    %c0_i32_1 = arith.constant 0 : i32
    %c0_i32_2 = arith.constant 0 : i32
    return %c0_i32, %c0_i32_0, %c0_i32_1 : i32, i32, i32
  }
  func.func @transform_2(%arg0: i32) -> (i32, i32, i32) {
    %c0_i32 = arith.constant 0 : i32
    %c0_i32_0 = arith.constant 0 : i32
    %c0_i32_1 = arith.constant 0 : i32
    return %arg0, %c0_i32, %c0_i32_0 : i32, i32, i32
  }
  func.func @transform_3(%arg0: i32) -> (i32, i32, i32) {
    %c0_i32 = arith.constant 0 : i32
    %c0_i32_0 = arith.constant 0 : i32
    %c0_i32_1 = arith.constant 0 : i32
    return %arg0, %c0_i32, %c0_i32_0 : i32, i32, i32
  }
}

module attributes {stable_mosaic.version = 11 : i64} {
  func.func @_conv2_kernel(%arg0: i32, %arg1: memref<1x16x128xf32, #tpu.memory_space<vmem>>, %arg2: memref<1x128xf32, #tpu.memory_space<vmem>>, %arg3: memref<1x128xf32, #tpu.memory_space<vmem>>, %arg4: memref<3x128x128xf32, #tpu.memory_space<vmem>>, %arg5: memref<1x16x128xf32, #tpu.memory_space<vmem>>, %arg6: memref<1x2x128xf32, #tpu.memory_space<vmem>>, %arg7: memref<18x128xf32, #tpu.memory_space<vmem>>) attributes {dimension_semantics = [#tpu.dimension_semantics<parallel>], iteration_bounds = array<i64: 2>, scalar_prefetch = 0 : i64, scratch_operands = 1 : i64, tpu.core_type = #tpu.core_type<tc>, window_params = [{transform_indices = @transform_0, window_bounds = array<i64: 1, 16, 128>}, {pipeline_mode = #tpu.pipeline_mode<synchronous>, transform_indices = @transform_1, window_bounds = array<i64: 1, 128>}, {pipeline_mode = #tpu.pipeline_mode<synchronous>, transform_indices = @transform_2, window_bounds = array<i64: 1, 128>}, {pipeline_mode = #tpu.pipeline_mode<synchronous>, transform_indices = @transform_3, window_bounds = array<i64: 3, 128, 128>}, {transform_indices = @transform_4, window_bounds = array<i64: 1, 16, 128>}, {transform_indices = @transform_5, window_bounds = array<i64: 1, 2, 128>}]} {
    %c0 = arith.constant 0 : index
    %c0_0 = arith.constant 0 : index
    %0 = vector.load %arg2[%c0, %c0_0] : memref<1x128xf32, #tpu.memory_space<vmem>>, vector<1x128xf32>
    %c0_1 = arith.constant 0 : index
    %c0_2 = arith.constant 0 : index
    %1 = vector.load %arg3[%c0_1, %c0_2] : memref<1x128xf32, #tpu.memory_space<vmem>>, vector<1x128xf32>
    %cst = arith.constant 0.000000e+00 : f32
    %2 = vector.broadcast %cst : f32 to vector<1x128xf32>
    %c0_3 = arith.constant 0 : index
    %c0_4 = arith.constant 0 : index
    %3 = vector.load %arg7[%c0_3, %c0_4] : memref<18x128xf32, #tpu.memory_space<vmem>>, vector<1x128xf32>
    tpu.vector_store %arg7[%c0_3, %c0_4], %2 {strides = array<i32>} : memref<18x128xf32, #tpu.memory_space<vmem>>, vector<1x128xf32>,
    %c17 = arith.constant 17 : index
    %c0_5 = arith.constant 0 : index
    %4 = vector.load %arg7[%c17, %c0_5] : memref<18x128xf32, #tpu.memory_space<vmem>>, vector<1x128xf32>
    tpu.vector_store %arg7[%c17, %c0_5], %2 {strides = array<i32>} : memref<18x128xf32, #tpu.memory_space<vmem>>, vector<1x128xf32>,
    %cst_6 = arith.constant 0.000000e+00 : f32
    %5 = vector.broadcast %cst_6 : f32 to vector<1x128xf32>
    %cst_7 = arith.constant 0.000000e+00 : f32
    %6 = vector.broadcast %cst_7 : f32 to vector<1x128xf32>
    %c0_8 = arith.constant 0 : index
    %c0_9 = arith.constant 0 : index
    %c0_10 = arith.constant 0 : index
    %7 = vector.load %arg1[%c0_8, %c0_9, %c0_10] : memref<1x16x128xf32, #tpu.memory_space<vmem>>, vector<1x16x128xf32>
    %8 = vector.shape_cast %7 : vector<1x16x128xf32> to vector<16x128xf32>
    %9 = vector.broadcast %0 : vector<1x128xf32> to vector<16x128xf32>
    %10 = arith.mulf %8, %9 : vector<16x128xf32>
    %11 = vector.broadcast %1 : vector<1x128xf32> to vector<16x128xf32>
    %12 = arith.addf %10, %11 : vector<16x128xf32>
    %cst_11 = arith.constant 0.000000e+00 : f32
    %13 = vector.broadcast %cst_11 : f32 to vector<16x128xf32>
    %14 = arith.cmpf ogt, %12, %13 : vector<16x128xf32>
    %cst_12 = arith.constant 0.00999999977 : f32
    %15 = vector.broadcast %cst_12 : f32 to vector<16x128xf32>
    %16 = arith.mulf %15, %12 : vector<16x128xf32>
    %17 = arith.select %14, %12, %16 : vector<16x128xi1>, vector<16x128xf32>
    %c1 = arith.constant 1 : index
    %c0_13 = arith.constant 0 : index
    %18 = vector.load %arg7[%c1, %c0_13] : memref<18x128xf32, #tpu.memory_space<vmem>>, vector<16x128xf32>
    tpu.vector_store %arg7[%c1, %c0_13], %17 {strides = array<i32>} : memref<18x128xf32, #tpu.memory_space<vmem>>, vector<16x128xf32>,
    %cst_14 = arith.constant 0.000000e+00 : f32
    %19 = vector.broadcast %cst_14 : f32 to vector<16x128xf32>
    %c0_15 = arith.constant 0 : index
    %c0_16 = arith.constant 0 : index
    %20 = vector.load %arg7[%c0_15, %c0_16] : memref<18x128xf32, #tpu.memory_space<vmem>>, vector<16x128xf32>
    %c0_17 = arith.constant 0 : index
    %c0_18 = arith.constant 0 : index
    %c0_19 = arith.constant 0 : index
    %21 = vector.load %arg4[%c0_17, %c0_18, %c0_19] : memref<3x128x128xf32, #tpu.memory_space<vmem>>, vector<1x128x128xf32>
    %22 = vector.shape_cast %21 : vector<1x128x128xf32> to vector<128x128xf32>
    %cst_20 = arith.constant dense<0.000000e+00> : vector<16x128xf32>
    %23 = tpu.matmul %20, %22, %cst_20 {dimension_numbers = #tpu.dot_dimension_numbers<[1], [0], [0], [1], [0, 0, 1, 1], [], []>} : vector<16x128xf32>, vector<128x128xf32>, vector<16x128xf32> -> vector<16x128xf32>
    %24 = arith.addf %19, %23 : vector<16x128xf32>
    %c1_21 = arith.constant 1 : index
    %c0_22 = arith.constant 0 : index
    %25 = vector.load %arg7[%c1_21, %c0_22] : memref<18x128xf32, #tpu.memory_space<vmem>>, vector<16x128xf32>
    %c1_23 = arith.constant 1 : index
    %c0_24 = arith.constant 0 : index
    %c0_25 = arith.constant 0 : index
    %26 = vector.load %arg4[%c1_23, %c0_24, %c0_25] : memref<3x128x128xf32, #tpu.memory_space<vmem>>, vector<1x128x128xf32>
    %27 = vector.shape_cast %26 : vector<1x128x128xf32> to vector<128x128xf32>
    %cst_26 = arith.constant dense<0.000000e+00> : vector<16x128xf32>
    %28 = tpu.matmul %25, %27, %cst_26 {dimension_numbers = #tpu.dot_dimension_numbers<[1], [0], [0], [1], [0, 0, 1, 1], [], []>} : vector<16x128xf32>, vector<128x128xf32>, vector<16x128xf32> -> vector<16x128xf32>
    %29 = arith.addf %24, %28 : vector<16x128xf32>
    %c2 = arith.constant 2 : index
    %c0_27 = arith.constant 0 : index
    %30 = vector.load %arg7[%c2, %c0_27] : memref<18x128xf32, #tpu.memory_space<vmem>>, vector<16x128xf32>
    %c2_28 = arith.constant 2 : index
    %c0_29 = arith.constant 0 : index
    %c0_30 = arith.constant 0 : index
    %31 = vector.load %arg4[%c2_28, %c0_29, %c0_30] : memref<3x128x128xf32, #tpu.memory_space<vmem>>, vector<1x128x128xf32>
    %32 = vector.shape_cast %31 : vector<1x128x128xf32> to vector<128x128xf32>
    %cst_31 = arith.constant dense<0.000000e+00> : vector<16x128xf32>
    %33 = tpu.matmul %30, %32, %cst_31 {dimension_numbers = #tpu.dot_dimension_numbers<[1], [0], [0], [1], [0, 0, 1, 1], [], []>} : vector<16x128xf32>, vector<128x128xf32>, vector<16x128xf32> -> vector<16x128xf32>
    %34 = arith.addf %29, %33 : vector<16x128xf32>
    %c0_32 = arith.constant 0 : index
    %c0_33 = arith.constant 0 : index
    %c0_34 = arith.constant 0 : index
    %35 = vector.load %arg5[%c0_32, %c0_33, %c0_34] : memref<1x16x128xf32, #tpu.memory_space<vmem>>, vector<1x16x128xf32>
    %36 = vector.shape_cast %35 : vector<1x16x128xf32> to vector<16x128xf32>
    %37 = vector.shape_cast %34 : vector<16x128xf32> to vector<1x16x128xf32>
    tpu.vector_store %arg5[%c0_32, %c0_33, %c0_34], %37 {strides = array<i32>} : memref<1x16x128xf32, #tpu.memory_space<vmem>>, vector<1x16x128xf32>,
    %cst_35 = arith.constant dense<0.000000e+00> : vector<128xf32>
    %38 = vector.multi_reduction <add>, %34, %cst_35 [0] : vector<16x128xf32> to vector<128xf32>
    %39 = vector.shape_cast %38 : vector<128xf32> to vector<1x128xf32>
    %40 = arith.addf %5, %39 : vector<1x128xf32>
    %41 = arith.mulf %34, %34 : vector<16x128xf32>
    %cst_36 = arith.constant dense<0.000000e+00> : vector<128xf32>
    %42 = vector.multi_reduction <add>, %41, %cst_36 [0] : vector<16x128xf32> to vector<128xf32>
    %43 = vector.shape_cast %42 : vector<128xf32> to vector<1x128xf32>
    %44 = arith.addf %6, %43 : vector<1x128xf32>
    %45 = tpu.concatenate %40, %44 in 0 : vector<1x128xf32>, vector<1x128xf32> -> vector<2x128xf32>
    %c0_37 = arith.constant 0 : index
    %c0_38 = arith.constant 0 : index
    %c0_39 = arith.constant 0 : index
    %46 = vector.load %arg6[%c0_37, %c0_38, %c0_39] : memref<1x2x128xf32, #tpu.memory_space<vmem>>, vector<1x2x128xf32>
    %47 = vector.shape_cast %46 : vector<1x2x128xf32> to vector<2x128xf32>
    %48 = vector.shape_cast %45 : vector<2x128xf32> to vector<1x2x128xf32>
    tpu.vector_store %arg6[%c0_37, %c0_38, %c0_39], %48 {strides = array<i32>} : memref<1x2x128xf32, #tpu.memory_space<vmem>>, vector<1x2x128xf32>,
    return
  }
  func.func @transform_0(%arg0: i32) -> (i32, i32, i32) {
    %c0_i32 = arith.constant 0 : i32
    %c0_i32_0 = arith.constant 0 : i32
    %c0_i32_1 = arith.constant 0 : i32
    return %arg0, %c0_i32, %c0_i32_0 : i32, i32, i32
  }
  func.func @transform_1(%arg0: i32) -> (i32, i32) {
    %c0_i32 = arith.constant 0 : i32
    %c0_i32_0 = arith.constant 0 : i32
    %c0_i32_1 = arith.constant 0 : i32
    return %c0_i32, %c0_i32_0 : i32, i32
  }
  func.func @transform_2(%arg0: i32) -> (i32, i32) {
    %c0_i32 = arith.constant 0 : i32
    %c0_i32_0 = arith.constant 0 : i32
    %c0_i32_1 = arith.constant 0 : i32
    return %c0_i32, %c0_i32_0 : i32, i32
  }
  func.func @transform_3(%arg0: i32) -> (i32, i32, i32) {
    %c0_i32 = arith.constant 0 : i32
    %c0_i32_0 = arith.constant 0 : i32
    %c0_i32_1 = arith.constant 0 : i32
    %c0_i32_2 = arith.constant 0 : i32
    return %c0_i32, %c0_i32_0, %c0_i32_1 : i32, i32, i32
  }
  func.func @transform_4(%arg0: i32) -> (i32, i32, i32) {
    %c0_i32 = arith.constant 0 : i32
    %c0_i32_0 = arith.constant 0 : i32
    %c0_i32_1 = arith.constant 0 : i32
    return %arg0, %c0_i32, %c0_i32_0 : i32, i32, i32
  }
  func.func @transform_5(%arg0: i32) -> (i32, i32, i32) {
    %c0_i32 = arith.constant 0 : i32
    %c0_i32_0 = arith.constant 0 : i32
    %c0_i32_1 = arith.constant 0 : i32
    return %arg0, %c0_i32, %c0_i32_0 : i32, i32, i32
  }
}

</mosaic_0001>

<bundles_post_ra>
// kernel: residual_block.2
= control target key start
LH: loop header
LB: loop body
LE: loop exit
PB: predicated region body
PF: predicated region fallthrough
CT: control target
= control target key end

     0   :  { %s789_s12 = smov 0   ;;  %s897_s0 = inlined_call_operand.vmem [shape: f32[2,16,64], index: 0, kind: input, shape index: {}]   ;;  %s898_s1 = inlined_call_operand.vmem [shape: f32[3,64,128], index: 1, kind: input, shape index: {}]   ;;  %s899_s2 = inlined_call_operand.vmem [shape: f32[2,16,128], index: 2, kind: output, shape index: {0}]   ;;  %s900_s3 = inlined_call_operand.vmem [shape: f32[2,2,128], index: 3, kind: output, shape index: {1}]  }
   0x1 LB: > { %s576_s13 = sadd.s32 4294967295, %s766_s12   ;;  %p580_p0 = scmp.ge.s32.totalorder %s766_s12, 1  ;;  %s766_s12 = sphi %s789_s12, %s14_s12  }
   0x2   : > { %p140_p1 = scmp.lt.s32.totalorder %s766_s12, 3 }
   0x4   : > { %p141_p2 = pnand %p580_p0, %p140_p1 }
   0x5   : > { %v192_v0 = vld [vmem:[%s898_s1] sm:$0xff] (!%p141_p2)  ;;  %v193_v1 = vld [vmem:[%s898_s1 + $0x8] sm:$0xff] (!%p141_p2)  ;;  %v194_v2 = vld [vmem:[%s898_s1 + $0x10] sm:$0xff] (!%p141_p2)  ;;  %p168_p3 = scmp.lt.s32.totalorder (!%p141_p2), %s576_s13, 1  ;;  %vm182_vm0 = vcmask (!%p141_p2), 516096   ;;  %v768_v5 = vmov (!%p141_p2), 0.0  }
   0x6   : > { %144 = sbr.rel (%p141_p2) target bundleno = 275 (0x113), region = 28  ;;  %v715_v3 = vpack.c.bf16 (!%p141_p2), %v193_v1, %v192_v0  ;;  %v195_v4 = vld [vmem:[%s898_s1 + $0x18] sm:$0xff] (!%p141_p2)  ;;  %183 = vst.msk [vmem:[#allocation2] sm:$0x1] (!%p141_p2), %vm182_vm0, %v768_v5  ;;  %184 = vst.msk [vmem:[#allocation2 + $0x11] sm:$0x1] (!%p141_p2), %vm182_vm0, %v768_v5 }
   0x7   : > { %v719_v6 = vpack.c.bf16 (!%p141_p2), %v195_v4, %v194_v2  ;;  %v196_v7 = vld [vmem:[%s898_s1 + $0x20] sm:$0xff] (!%p141_p2)  ;;  %v197_v8 = vld [vmem:[%s898_s1 + $0x28] sm:$0xff] (!%p141_p2)  ;;  %vm187_vm1 = vcmask (!%p141_p2), 523264   ;;  %v588_v12 = vld [vmem:[%s898_s1 + $0x50] sm:$0xff] (!%p141_p2)  ;;  %vm487_vm2 = vcmask (!%p141_p2), 1040384  }
   0x8   : > { %v586_v9 = vld [vmem:[%s898_s1 + $0x40] sm:$0xff] (!%p141_p2)  ;;  %716 = vmatprep.subr.bf16.mxu0 (!%p141_p2), %v715_v3  ;;  %v587_v10 = vld [vmem:[%s898_s1 + $0x48] sm:$0xff] (!%p141_p2)  ;;  %v589_v13 = vld [vmem:[%s898_s1 + $0x58] sm:$0xff] (!%p141_p2)  ;;  %v723_v14 = vpack.c.bf16 (!%p141_p2), %v197_v8, %v196_v7 }
   0x9   : > { %718 = vmatpush3.bf16.msra.mxu0 (!%p141_p2), %v715_v3  ;;  %v699_v11 = vpack.c.bf16 (!%p141_p2), %v587_v10, %v586_v9  ;;  %v198_v15 = vld [vmem:[%s898_s1 + $0x30] sm:$0xff] (!%p141_p2)  ;;  %v703_v16 = vpack.c.bf16 (!%p141_p2), %v589_v13, %v588_v12  ;;  %v590_v17 = vld [vmem:[%s898_s1 + $0x60] sm:$0xff] (!%p141_p2)  ;;  %v591_v18 = vld [vmem:[%s898_s1 + $0x68] sm:$0xff] (!%p141_p2) }
   0xa   : > { %720 = vmatprep.subr.bf16.mxu0 (!%p141_p2), %v719_v6  ;;  %v199_v19 = vld [vmem:[%s898_s1 + $0x38] sm:$0xff] (!%p141_p2)  ;;  %v707_v22 = vpack.c.bf16 (!%p141_p2), %v591_v18, %v590_v17  ;;  %v592_v24 = vld [vmem:[%s898_s1 + $0x70] sm:$0xff] (!%p141_p2)  ;;  %v598_v26 = vld [vmem:[%s898_s1 + $0x80] sm:$0xff] (!%p141_p2) }
   0xb   : > { %700 = vmatprep.subr.bf16.mxu1 (!%p141_p2), %v699_v11  ;;  %v727_v23 = vpack.c.bf16 (!%p141_p2), %v199_v19, %v198_v15  ;;  %v593_v25 = vld [vmem:[%s898_s1 + $0x78] sm:$0xff] (!%p141_p2)  ;;  %v599_v27 = vld [vmem:[%s898_s1 + $0x88] sm:$0xff] (!%p141_p2)  ;;  %v600_v30 = vld [vmem:[%s898_s1 + $0x90] sm:$0xff] (!%p141_p2) }
   0xc   : > { %702 = vmatpush3.bf16.msra.mxu1 (!%p141_p2), %v699_v11  ;;  %v711_v28 = vpack.c.bf16 (!%p141_p2), %v593_v25, %v592_v24  ;;  %v731_v29 = vpack.c.bf16 (!%p141_p2), %v599_v27, %v598_v26  ;;  %v601_v32 = vld [vmem:[%s898_s1 + $0x98] sm:$0xff] (!%p141_p2)  ;;  %v602_v37 = vld [vmem:[%s898_s1 + $0xa0] sm:$0xff] (!%p141_p2)  ;;  %v603_v38 = vld [vmem:[%s898_s1 + $0xa8] sm:$0xff] (!%p141_p2) }
   0xd   : > { %s902_s13 = smov (!%p168_p3, %s576_s13), 1  ;;  %722 = vmatpush3.bf16.msra.mxu0 %v719_v6  ;;  %704 = vmatprep.subr.bf16.mxu1 %v703_v16  ;;  %v735_v35 = vpack.c.bf16 %v601_v32, %v600_v30  ;;  %v739_v40 = vpack.c.bf16 %v603_v38, %v602_v37  ;;  %v604_v41 = vld [vmem:[%s898_s1 + $0xb0] sm:$0xff]  ;;  %v605_v42 = vld [vmem:[%s898_s1 + $0xb8] sm:$0xff] }
   0xe   : > { %s610_s30 = sshll.u32 %s902_s13, 4  ;;  %724 = vmatprep.subr.bf16.mxu0 %v723_v14  ;;  %v743_v43 = vpack.c.bf16 %v605_v42, %v604_v41 }
   0xf   : > { %s172_s14 = scalar_lea.vmem %s897_s0, %s610_s30  ;;  %s177_s19 = scalar_lea.vmem %s899_s2, %s610_s30 }
  0x10   : > { %v185_v20 = vld [vmem:[%s172_s14] sm:$0xff]  ;;  %v186_v21 = vld [vmem:[%s172_s14 + $0x8] sm:$0xff]  ;;  %706 = vmatpush3.bf16.msra.mxu1 %v703_v16  ;;  %s585_s30 = sshll.u32 %s902_s13, 1 }
  0x11   : > { %188 = vst.msk [vmem:[#allocation2 + $0x1] sm:$0xff] %vm187_vm1, %v185_v20  ;;  %189 = vst.msk [vmem:[#allocation2 + $0x9] sm:$0xff] %vm187_vm1, %v186_v21  ;;  %726 = vmatpush3.bf16.msra.mxu0 %v723_v14  ;;  %708 = vmatprep.subr.bf16.mxu1 %v707_v22  ;;  %s181_s22 = scalar_lea.vmem %s900_s3, %s585_s30 }
  0x12   : > { %728 = vmatprep.subr.bf16.mxu0 %v727_v23 }
  0x14   : > { %710 = vmatpush3.bf16.msra.mxu1 %v707_v22 }
  0x15   : > { %730 = vmatpush3.bf16.msra.mxu0 %v727_v23  ;;  %712 = vmatprep.subr.bf16.mxu1 %v711_v28 }
  0x16   : > { %732 = vmatprep.subr.bf16.mxu0 %v731_v29 }
  0x18   : > { %v190_v31 = vld [vmem:[#allocation2] sm:$0xff]  ;;  %v191_v34 = vld [vmem:[#allocation2 + $0x8] sm:$0xff]  ;;  %714 = vmatpush3.bf16.msra.mxu1 %v711_v28 }
  0x19   : > { %v200_v33 = vld [vmem:[#allocation2 + $0x1] sm:$0xff]  ;;  %677 = vmatprep.mubr.msk.f32.mxu0 %vm187_vm1, %v190_v31  ;;  %v201_v39 = vld [vmem:[#allocation2 + $0x9] sm:$0xff] }
  0x1a   : > { %658 = vmatprep.mubr.msk.f32.mxu1 %vm187_vm1, %v200_v33  ;;  %v373_v36 = vld [vmem:[#allocation2 + $0x2] sm:$0xff]  ;;  %678 = vmatmul.mubr.msk.f32.vlgmr.msra.gmra.mrb[0].mxu0 %vm187_vm1, %v191_v34  ;;  %v374_v44 = vld [vmem:[#allocation2 + $0xa] sm:$0xff] }
  0x1b   : > { %734 = vmatpush3.bf16.msra.mxu0 %v731_v29  ;;  %696 = vmatprep.mubr.msk.f32.mxu0 %vm187_vm1, %v373_v36 }
  0x1c   : > { %736 = vmatprep.subr.bf16.mxu0 %v735_v35  ;;  %659 = vmatmul.mubr.msk.f32.vlgmr.msra.gmra.mrb[0].mxu1 %vm187_vm1, %v201_v39 }
  0x1f   : > { %738 = vmatpush3.bf16.msra.mxu0 %v735_v35 }
  0x20   : > { %740 = vmatprep.subr.bf16.mxu0 %v739_v40 }
  0x23   : > { %742 = vmatpush3.bf16.msra.mxu0 %v739_v40 }
  0x24   : > { %744 = vmatprep.subr.bf16.mxu0 %v743_v43 }
  0x27   : > { %746 = vmatpush3.bf16.msra.mxu0 %v743_v43 }
  0x2a   : > { %697 = vmatmul.mubr.msk.f32.vlgmr.msra.gmra.mrb[0].mxu0 %vm187_vm1, %v374_v44 }
  0xef   : > { %v660_v45 = vpop.f32.mrb[0].mxu1 }
  0xf0   : > { %v283_v46 = vpop.f32.mrb[1].mxu1 }
  0xfd   : > { %v698_v47 = vpop.f32.mrb[0].mxu0 }
  0xfe   : > { %v747_v48 = vadd.f32 %v698_v47, %v660_v45  ;;  %v456_v49 = vpop.f32.mrb[1].mxu0 }
  0xff   : > { %v748_v50 = vadd.f32 %v456_v49, %v283_v46 }
 0x100   : > { %468 = vst [vmem:[%s177_s19 + $0x8] sm:$0xff] %v747_v48  ;;  %v478_v51 = vmul.f32 %v747_v48, %v747_v48 }
 0x101   : > { %467 = vst [vmem:[%s177_s19] sm:$0xff] %v748_v50  ;;  %v469_v52 = vadd.f32 %v748_v50, %v747_v48  ;;  %v477_v53 = vmul.f32 %v748_v50, %v748_v50 }
 0x103   : > { %v470_v54 = vrot.slane %v469_v52, 4  ;;  %v479_v55 = vadd.f32 %v478_v51, %v477_v53 }
 0x105   : > { %v471_v56 = vadd.f32 %v470_v54, %v469_v52  ;;  %v480_v57 = vrot.slane %v479_v55, 4 }
 0x107   : > { %v472_v58 = vrot.slane %v471_v56, 2  ;;  %v481_v59 = vadd.f32 %v480_v57, %v479_v55 }
 0x109   : > { %v473_v60 = vadd.f32 %v472_v58, %v471_v56  ;;  %v482_v61 = vrot.slane %v481_v59, 2 }
 0x10b   : > { %v474_v62 = vrot.slane %v473_v60, 1  ;;  %v483_v63 = vadd.f32 %v482_v61, %v481_v59 }
 0x10d   : > { %v484_v0 = vrot.slane %v483_v63, 1  ;;  %v475_v1 = vadd.f32 %v474_v62, %v473_v60 }
 0x10f   : > { %v485_v2 = vadd.f32 %v484_v0, %v483_v63 }
 0x111   : > { %v488_v3 = vsel %vm487_vm2, %v475_v1, %v485_v2 }
 0x112   : > { %489 = vst [vmem:[%s181_s22] sm:$0x3] %v488_v3 }
 0x113 PF: > { %s14_s12 = sadd.s32 1, %s766_s12  }
 0x114   : > { %p11_p4 = scmp.ge.s32.totalorder %s14_s12, 4  }
 0x116   :  { %13 = sbr.rel (!%p11_p4) target bundleno = 1 (0x1), region = 72 }

// kernel: tile.13
= control target key start
LH: loop header
LB: loop body
LE: loop exit
PB: predicated region body
PF: predicated region fallthrough
CT: control target
= control target key end

     0   :  { %s28_s0 = inlined_call_operand.vmem [shape: f32[8], index: 0, kind: input, shape index: {}]   ;;  %s29_s1 = inlined_call_operand.vmem [shape: f32[16,8], index: 1, kind: output, shape index: {}]  }
   0x1   :  { %v4_v0 = vld [vmem:[%s28_s0] ss:$0 sm:$0xff] }
   0x2   :  { %5 = vst [vmem:[%s29_s1] sm:$0xff] %v4_v0  ;;  %8 = vst [vmem:[%s29_s1 + $0x8] sm:$0xff] %v4_v0 }

// kernel: tile.14
= control target key start
LH: loop header
LB: loop body
LE: loop exit
PB: predicated region body
PF: predicated region fallthrough
CT: control target
= control target key end

     0   :  { %s131_s10 = smov 120   ;;  %s132_s11 = smov 104   ;;  %vm3_vm0 = vcmask 64512   ;;  %vm9_vm1 = vcmask 1048512   ;;  %vm15_vm2 = vcmask 982912   ;;  %vm21_vm3 = vcmask 917312   ;;  %s207_s0 = inlined_call_operand.vmem [shape: f32[16,8], index: 0, kind: input, shape index: {}]   ;;  %s208_s1 = inlined_call_operand.vmem [shape: f32[1,128], index: 1, kind: output, shape index: {}]  }
   0x1   :  { %v101_v0 = vld [vmem:[%s207_s0 + $0xf] sm:$0x1]   ;;  %v103_v1 = vld [vmem:[%s207_s0 + $0xd] sm:$0x1]   ;;  %v102_v2 = vld [vmem:[%s207_s0 + $0xe] sm:$0x1]  }
   0x2   :  { %7 = vrot.lane.b32.xlu0 %v101_v0, %s131_s10  ;;  %19 = vrot.lane.b32.xlu1 %v103_v1, %s132_s11  ;;  %v104_v3 = vld [vmem:[%s207_s0 + $0xc] sm:$0x1]   ;;  %s133_s16 = smov 112   ;;  %s134_s17 = smov 96   ;;  %v105_v4 = vld [vmem:[%s207_s0 + $0xb] sm:$0x1]  }
   0x3   :  { %v106_v5 = vld [vmem:[%s207_s0 + $0xa] sm:$0x1]   ;;  %v2_v6 = vld [vmem:[%s207_s0] sm:$0x1]   ;;  %s135_s24 = smov 88   ;;  %s136_s25 = smov 80  }
   0x4   :  { %4 = vst.msk [vmem:[#allocation0] sm:$0x1] %vm3_vm0, %v2_v6   ;;  %v107_v7 = vld [vmem:[%s207_s0 + $0x9] sm:$0x1]   ;;  %v108_v8 = vld [vmem:[%s207_s0 + $0x8] sm:$0x1]  }
   0x5   :  { %s137_s30 = smov 72   ;;  %s138_s2 = smov 64   ;;  %v109_v9 = vld [vmem:[%s207_s0 + $0x7] sm:$0x1]   ;;  %v110_v10 = vld [vmem:[%s207_s0 + $0x6] sm:$0x1]  }
   0x6   :  { %13 = vrot.lane.b32.xlu0 %v102_v2, %s133_s16  ;;  %25 = vrot.lane.b32.xlu1 %v104_v3, %s134_s17  ;;  %s139_s7 = smov 56   ;;  %s140_s8 = smov 48   ;;  %v111_v11 = vld [vmem:[%s207_s0 + $0x5] sm:$0x1]   ;;  %v112_v12 = vld [vmem:[%s207_s0 + $0x4] sm:$0x1]  }
   0x7   :  { %s141_s13 = smov 40   ;;  %s142_s14 = smov 32   ;;  %v113_v13 = vld [vmem:[%s207_s0 + $0x3] sm:$0x1]   ;;  %v114_v14 = vld [vmem:[%s207_s0 + $0x2] sm:$0x1]  }
   0x8   :  { %s143_s19 = smov 24   ;;  %s144_s20 = smov 16   ;;  %v115_v15 = vld [vmem:[%s207_s0 + $0x1] sm:$0x1]   ;;  %vm27_vm4 = vcmask 851712   ;;  %vm33_vm5 = vcmask 786112  }
   0x9   :  { %s145_s0 = smov 8   ;;  %vm39_vm6 = vcmask 720512   ;;  %vm45_vm7 = vcmask 654912   ;;  %vm51_vm8 = vcmask 589312   ;;  %vm57_vm9 = vcmask 523712  }
   0xa   :  { %31 = vrot.lane.b32.xlu0 %v105_v4, %s135_s24  ;;  %37 = vrot.lane.b32.xlu1 %v106_v5, %s136_s25  ;;  %vm63_vm10 = vcmask 458112   ;;  %vm69_vm11 = vcmask 392512   ;;  %vm75_vm12 = vcmask 326912   ;;  %vm81_vm13 = vcmask 261312  }
   0xb   :  { %vm87_vm14 = vcmask 195712   ;;  %vm93_vm15 = vcmask 130112  }
   0xe   :  { %43 = vrot.lane.b32.xlu0 %v107_v7, %s137_s30  ;;  %49 = vrot.lane.b32.xlu1 %v108_v8, %s138_s2 }
  0x12   :  { %55 = vrot.lane.b32.xlu0 %v109_v9, %s139_s7  ;;  %61 = vrot.lane.b32.xlu1 %v110_v10, %s140_s8 }
  0x16   :  { %67 = vrot.lane.b32.xlu0 %v111_v11, %s141_s13  ;;  %73 = vrot.lane.b32.xlu1 %v112_v12, %s142_s14 }
  0x1a   :  { %79 = vrot.lane.b32.xlu0 %v113_v13, %s143_s19  ;;  %85 = vrot.lane.b32.xlu1 %v114_v14, %s144_s20 }
  0x1e   :  { %91 = vrot.lane.b32.xlu0 %v115_v15, %s145_s0 }
  0x74   :  { %v8_v16 = vpop.permute.xlu0 %7   ;;  %v20_v17 = vpop.permute.xlu1 %19  }
  0x75   :  { %10 = vst.msk [vmem:[#allocation0] sm:$0x1] %vm9_vm1, %v8_v16  }
  0x78   :  { %v14_v18 = vpop.permute.xlu0 %13   ;;  %v26_v19 = vpop.permute.xlu1 %25  }
  0x79   :  { %16 = vst.msk [vmem:[#allocation0] sm:$0x1] %vm15_vm2, %v14_v18  }
  0x7a   :  { %22 = vst.msk [vmem:[#allocation0] sm:$0x1] %vm21_vm3, %v20_v17  }
  0x7b   :  { %28 = vst.msk [vmem:[#allocation0] sm:$0x1] %vm27_vm4, %v26_v19  }
  0x7c   :  { %v32_v20 = vpop.permute.xlu0 %31   ;;  %v38_v21 = vpop.permute.xlu1 %37  }
  0x7d   :  { %34 = vst.msk [vmem:[#allocation0] sm:$0x1] %vm33_vm5, %v32_v20  }
  0x7e   :  { %40 = vst.msk [vmem:[#allocation0] sm:$0x1] %vm39_vm6, %v38_v21  }
  0x80   :  { %v44_v22 = vpop.permute.xlu0 %43   ;;  %v50_v23 = vpop.permute.xlu1 %49  }
  0x81   :  { %46 = vst.msk [vmem:[#allocation0] sm:$0x1] %vm45_vm7, %v44_v22  }
  0x82   :  { %52 = vst.msk [vmem:[#allocation0] sm:$0x1] %vm51_vm8, %v50_v23  }
  0x84   :  { %v56_v24 = vpop.permute.xlu0 %55   ;;  %v62_v25 = vpop.permute.xlu1 %61  }
  0x85   :  { %58 = vst.msk [vmem:[#allocation0] sm:$0x1] %vm57_vm9, %v56_v24  }
  0x86   :  { %64 = vst.msk [vmem:[#allocation0] sm:$0x1] %vm63_vm10, %v62_v25  }
  0x88   :  { %v68_v26 = vpop.permute.xlu0 %67   ;;  %v74_v27 = vpop.permute.xlu1 %73  }
  0x89   :  { %70 = vst.msk [vmem:[#allocation0] sm:$0x1] %vm69_vm11, %v68_v26  }
  0x8a   :  { %76 = vst.msk [vmem:[#allocation0] sm:$0x1] %vm75_vm12, %v74_v27  }
  0x8c   :  { %v80_v28 = vpop.permute.xlu0 %79   ;;  %v86_v29 = vpop.permute.xlu1 %85  }
  0x8d   :  { %82 = vst.msk [vmem:[#allocation0] sm:$0x1] %vm81_vm13, %v80_v28  }
  0x8e   :  { %88 = vst.msk [vmem:[#allocation0] sm:$0x1] %vm87_vm14, %v86_v29  }
  0x90   :  { %v92_v30 = vpop.permute.xlu0 %91  }
  0x91   :  { %94 = vst.msk [vmem:[#allocation0] sm:$0x1] %vm93_vm15, %v92_v30  }
  0x98   :  { %v98_v31 = vld [vmem:[#allocation0] sm:$0x1] }
  0x99   :  { %100 = vst [vmem:[%s208_s1] sm:$0x1] %v98_v31 }

// kernel: residual_block.3
= control target key start
LH: loop header
LB: loop body
LE: loop exit
PB: predicated region body
PF: predicated region fallthrough
CT: control target
= control target key end

     0   :  { %s1013_s18 = smov 0   ;;  %s1195_s0 = inlined_call_operand.vmem [shape: f32[2,16,128], index: 0, kind: input, shape index: {}]   ;;  %s1196_s1 = inlined_call_operand.vmem [shape: f32[1,128], index: 1, kind: input, shape index: {}]   ;;  %s1197_s2 = inlined_call_operand.vmem [shape: f32[1,128], index: 2, kind: input, shape index: {}]   ;;  %s1198_s3 = inlined_call_operand.vmem [shape: f32[3,128,128], index: 3, kind: input, shape index: {}]   ;;  %s1199_s4 = inlined_call_operand.vmem [shape: f32[2,16,128], index: 4, kind: output, shape index: {0}]   ;;  %s1200_s5 = inlined_call_operand.vmem [shape: f32[2,2,128], index: 5, kind: output, shape index: {1}]  }
   0x1 LB: > { %s658_s19 = sadd.s32 4294967295, %s980_s18   ;;  %p662_p0 = scmp.ge.s32.totalorder %s980_s18, 1  ;;  %s980_s18 = sphi %s1013_s18, %s16_s18  }
   0x2   : > { %p190_p1 = scmp.lt.s32.totalorder %s980_s18, 3 }
   0x4   : > { %p191_p2 = pnand %p662_p0, %p190_p1 }
   0x5   : > { %v268_v0 = vld [vmem:[%s1198_s3] sm:$0xff] (!%p191_p2)  ;;  %v269_v1 = vld [vmem:[%s1198_s3 + $0x8] sm:$0xff] (!%p191_p2)  ;;  %v270_v2 = vld [vmem:[%s1198_s3 + $0x10] sm:$0xff] (!%p191_p2)  ;;  %p222_p3 = scmp.lt.s32.totalorder (!%p191_p2), %s658_s19, 1  ;;  %v982_v5 = vmov (!%p191_p2), 0.0   ;;  %vm569_vm2 = vcmask (!%p191_p2), 1040384  }
   0x6   : > { %194 = sbr.rel (%p191_p2) target bundleno = 305 (0x131), region = 36  ;;  %v897_v3 = vpack.c.bf16 (!%p191_p2), %v269_v1, %v268_v0  ;;  %v271_v4 = vld [vmem:[%s1198_s3 + $0x18] sm:$0xff] (!%p191_p2)  ;;  %238 = vst [vmem:[#allocation2] sm:$0x1] (!%p191_p2), %v982_v5  ;;  %239 = vst [vmem:[#allocation2 + $0x11] sm:$0x1] (!%p191_p2), %v982_v5 }
   0x7   : > { %v901_v6 = vpack.c.bf16 (!%p191_p2), %v271_v4, %v270_v2  ;;  %v272_v7 = vld [vmem:[%s1198_s3 + $0x20] sm:$0xff] (!%p191_p2)  ;;  %v273_v8 = vld [vmem:[%s1198_s3 + $0x28] sm:$0xff] (!%p191_p2)  ;;  %v274_v9 = vld [vmem:[%s1198_s3 + $0x30] sm:$0xff] (!%p191_p2) }
   0x8   : > { %898 = vmatprep.subr.bf16.mxu0 (!%p191_p2), %v897_v3  ;;  %v905_v10 = vpack.c.bf16 (!%p191_p2), %v273_v8, %v272_v7  ;;  %v275_v11 = vld [vmem:[%s1198_s3 + $0x38] sm:$0xff] (!%p191_p2)  ;;  %v670_v12 = vld [vmem:[%s1198_s3 + $0x80] sm:$0xff] (!%p191_p2)  ;;  %v671_v13 = vld [vmem:[%s1198_s3 + $0x88] sm:$0xff] (!%p191_p2) }
   0x9   : > { %900 = vmatpush3.bf16.msra.mxu0 (!%p191_p2), %v897_v3  ;;  %v865_v14 = vpack.c.bf16 (!%p191_p2), %v671_v13, %v670_v12  ;;  %v668_v15 = vld [vmem:[%s1196_s1] ss:$0 sm:$0xff] (!%p191_p2)  ;;  %v672_v21 = vld [vmem:[%s1198_s3 + $0x90] sm:$0xff] (!%p191_p2)  ;;  %v673_v22 = vld [vmem:[%s1198_s3 + $0x98] sm:$0xff] (!%p191_p2)  ;;  %v909_v23 = vpack.c.bf16 (!%p191_p2), %v275_v11, %v274_v9 }
   0xa   : > { %902 = vmatprep.subr.bf16.mxu0 (!%p191_p2), %v901_v6  ;;  %v669_v16 = vld [vmem:[%s1197_s2] ss:$0 sm:$0xff] (!%p191_p2)  ;;  %v869_v25 = vpack.c.bf16 (!%p191_p2), %v673_v22, %v672_v21  ;;  %v675_v27 = vld [vmem:[%s1198_s3 + $0xa8] sm:$0xff] (!%p191_p2)  ;;  %v676_v33 = vld [vmem:[%s1198_s3 + $0xb0] sm:$0xff] (!%p191_p2) }
   0xb   : > { %866 = vmatprep.subr.bf16.mxu1 (!%p191_p2), %v865_v14  ;;  %v674_v26 = vld [vmem:[%s1198_s3 + $0xa0] sm:$0xff] (!%p191_p2)  ;;  %v277_v29 = vld [vmem:[%s1198_s3 + $0x48] sm:$0xff] (!%p191_p2)  ;;  %v677_v34 = vld [vmem:[%s1198_s3 + $0xb8] sm:$0xff] (!%p191_p2) }
   0xc   : > { %868 = vmatpush3.bf16.msra.mxu1 (!%p191_p2), %v865_v14  ;;  %v276_v28 = vld [vmem:[%s1198_s3 + $0x40] sm:$0xff] (!%p191_p2)  ;;  %v873_v31 = vpack.c.bf16 (!%p191_p2), %v675_v27, %v674_v26  ;;  %v278_v38 = vld [vmem:[%s1198_s3 + $0x50] sm:$0xff] (!%p191_p2)  ;;  %v279_v39 = vld [vmem:[%s1198_s3 + $0x58] sm:$0xff] (!%p191_p2)  ;;  %v877_v41 = vpack.c.bf16 (!%p191_p2), %v677_v34, %v676_v33 }
   0xd   : > { %s1202_s19 = smov (!%p222_p3, %s658_s19), 1  ;;  %904 = vmatpush3.bf16.msra.mxu0 %v901_v6  ;;  %870 = vmatprep.subr.bf16.mxu1 %v869_v25  ;;  %v913_v36 = vpack.c.bf16 %v277_v29, %v276_v28  ;;  %v678_v42 = vld [vmem:[%s1198_s3 + $0xc0] sm:$0xff]  ;;  %v679_v43 = vld [vmem:[%s1198_s3 + $0xc8] sm:$0xff]  ;;  %v917_v44 = vpack.c.bf16 %v279_v39, %v278_v38  ;;  %v680_v48 = vld [vmem:[%s1198_s3 + $0xd0] sm:$0xff] }
   0xe   : > { %s704_s9 = sshll.u32 %s1202_s19, 4  ;;  %906 = vmatprep.subr.bf16.mxu0 %v905_v10  ;;  %v280_v45 = vld [vmem:[%s1198_s3 + $0x60] sm:$0xff]  ;;  %v281_v46 = vld [vmem:[%s1198_s3 + $0x68] sm:$0xff]  ;;  %v881_v47 = vpack.c.bf16 %v679_v43, %v678_v42  ;;  %v681_v49 = vld [vmem:[%s1198_s3 + $0xd8] sm:$0xff] }
   0xf   : > { %s226_s20 = scalar_lea.vmem %s1195_s0, %s704_s9  ;;  %v921_v50 = vpack.c.bf16 %v281_v46, %v280_v45  ;;  %v282_v52 = vld [vmem:[%s1198_s3 + $0x70] sm:$0xff]  ;;  %v283_v53 = vld [vmem:[%s1198_s3 + $0x78] sm:$0xff]  ;;  %v885_v54 = vpack.c.bf16 %v681_v49, %v680_v48  ;;  %v682_v55 = vld [vmem:[%s1198_s3 + $0xe0] sm:$0xff]  ;;  %s231_s13 = scalar_lea.vmem %s1199_s4, %s704_s9 }
  0x10   : > { %v240_v17 = vld [vmem:[%s226_s20] sm:$0xff]  ;;  %v241_v19 = vld [vmem:[%s226_s20 + $0x8] sm:$0xff]  ;;  %872 = vmatpush3.bf16.msra.mxu1 %v869_v25  ;;  %v925_v57 = vpack.c.bf16 %v283_v53, %v282_v52  ;;  %v684_v61 = vld [vmem:[%s1198_s3 + $0xf0] sm:$0xff]  ;;  %s667_s9 = sshll.u32 %s1202_s19, 1 }
  0x11   : > { %v248_v18 = vmul.f32 %v668_v15, %v240_v17  ;;  %v249_v20 = vmul.f32 %v668_v15, %v241_v19  ;;  %908 = vmatpush3.bf16.msra.mxu0 %v905_v10  ;;  %874 = vmatprep.subr.bf16.mxu1 %v873_v31  ;;  %v683_v56 = vld [vmem:[%s1198_s3 + $0xe8] sm:$0xff]  ;;  %v686_v58 = vld [vmem:[%s1198_s3 + $0x100] sm:$0xff]  ;;  %v685_v62 = vld [vmem:[%s1198_s3 + $0xf8] sm:$0xff]  ;;  %s235_s16 = scalar_lea.vmem %s1200_s5, %s667_s9 }
  0x12   : > { %910 = vmatprep.subr.bf16.mxu0 %v909_v23  ;;  %v687_v59 = vld [vmem:[%s1198_s3 + $0x108] sm:$0xff]  ;;  %v889_v60 = vpack.c.bf16 %v683_v56, %v682_v55  ;;  %v688_v0 = vld [vmem:[%s1198_s3 + $0x110] sm:$0xff]  ;;  %v689_v1 = vld [vmem:[%s1198_s3 + $0x118] sm:$0xff]  ;;  %v893_v2 = vpack.c.bf16 %v685_v62, %v684_v61 }
  0x13   : > { %v256_v24 = vadd.f32 %v669_v16, %v248_v18  ;;  %v257_v30 = vadd.f32 %v669_v16, %v249_v20  ;;  %v929_v63 = vpack.c.bf16 %v687_v59, %v686_v58  ;;  %v933_v4 = vpack.c.bf16 %v689_v1, %v688_v0  ;;  %v690_v6 = vld [vmem:[%s1198_s3 + $0x120] sm:$0xff]  ;;  %v691_v7 = vld [vmem:[%s1198_s3 + $0x128] sm:$0xff]  ;;  %v692_v9 = vld [vmem:[%s1198_s3 + $0x130] sm:$0xff] }
  0x14   : > { %876 = vmatpush3.bf16.msra.mxu1 %v873_v31  ;;  %v937_v8 = vpack.c.bf16 %v691_v7, %v690_v6  ;;  %v693_v10 = vld [vmem:[%s1198_s3 + $0x138] sm:$0xff]  ;;  %v694_v12 = vld [vmem:[%s1198_s3 + $0x140] sm:$0xff]  ;;  %v695_v13 = vld [vmem:[%s1198_s3 + $0x148] sm:$0xff] }
  0x15   : > { %vm258_vm0 = vcmp.gt.f32.partialorder %v256_v24, 0.0  ;;  %v260_v32 = vmul.f32 0.01, %v256_v24  ;;  %vm259_vm1 = vcmp.gt.f32.partialorder %v257_v30, 0.0  ;;  %v261_v35 = vmul.f32 0.01, %v257_v30  ;;  %912 = vmatpush3.bf16.msra.mxu0 %v909_v23  ;;  %878 = vmatprep.subr.bf16.mxu1 %v877_v41 }
  0x16   : > { %914 = vmatprep.subr.bf16.mxu0 %v913_v36  ;;  %v941_v11 = vpack.c.bf16 %v693_v10, %v692_v9  ;;  %v945_v14 = vpack.c.bf16 %v695_v13, %v694_v12  ;;  %v696_v15 = vld [vmem:[%s1198_s3 + $0x150] sm:$0xff]  ;;  %v697_v16 = vld [vmem:[%s1198_s3 + $0x158] sm:$0xff]  ;;  %v698_v18 = vld [vmem:[%s1198_s3 + $0x160] sm:$0xff] }
  0x17   : > { %v262_v37 = vsel %vm258_vm0, %v256_v24, %v260_v32  ;;  %v1095_v40 = vsel %vm259_vm1, %v257_v30, %v261_v35  ;;  %v949_v17 = vpack.c.bf16 %v697_v16, %v696_v15  ;;  %v699_v19 = vld [vmem:[%s1198_s3 + $0x168] sm:$0xff]  ;;  %v700_v21 = vld [vmem:[%s1198_s3 + $0x170] sm:$0xff]  ;;  %v701_v22 = vld [vmem:[%s1198_s3 + $0x178] sm:$0xff] }
  0x18   : > { %264 = vst [vmem:[#allocation2 + $0x1] sm:$0xff] %v262_v37  ;;  %792 = vmatprep.mubr.f32.mxu1 %v262_v37  ;;  %265 = vst [vmem:[#allocation2 + $0x9] sm:$0xff] %v1095_v40  ;;  %880 = vmatpush3.bf16.msra.mxu1 %v877_v41  ;;  %v953_v20 = vpack.c.bf16 %v699_v19, %v698_v18  ;;  %v957_v23 = vpack.c.bf16 %v701_v22, %v700_v21 }
  0x19   : > { %916 = vmatpush3.bf16.msra.mxu0 %v913_v36  ;;  %882 = vmatprep.subr.bf16.mxu1 %v881_v47 }
  0x1a   : > { %918 = vmatprep.subr.bf16.mxu0 %v917_v44 }
  0x1c   : > { %884 = vmatpush3.bf16.msra.mxu1 %v881_v47 }
  0x1d   : > { %920 = vmatpush3.bf16.msra.mxu0 %v917_v44  ;;  %886 = vmatprep.subr.bf16.mxu1 %v885_v54 }
  0x1e   : > { %922 = vmatprep.subr.bf16.mxu0 %v921_v50 }
  0x1f   : > { %v266_v51 = vld [vmem:[#allocation2] sm:$0xff]  ;;  %v267_v3 = vld [vmem:[#allocation2 + $0x8] sm:$0xff] }
  0x20   : > { %827 = vmatprep.mubr.f32.mxu0 %v266_v51  ;;  %888 = vmatpush3.bf16.msra.mxu1 %v885_v54  ;;  %v453_v5 = vld [vmem:[#allocation2 + $0x2] sm:$0xff]  ;;  %v454_v24 = vld [vmem:[#allocation2 + $0xa] sm:$0xff] }
  0x21   : > { %924 = vmatpush3.bf16.msra.mxu0 %v921_v50  ;;  %890 = vmatprep.subr.bf16.mxu1 %v889_v60 }
  0x22   : > { %926 = vmatprep.subr.bf16.mxu0 %v925_v57 }
  0x24   : > { %892 = vmatpush3.bf16.msra.mxu1 %v889_v60 }
  0x25   : > { %928 = vmatpush3.bf16.msra.mxu0 %v925_v57  ;;  %894 = vmatprep.subr.bf16.mxu1 %v893_v2 }
  0x26   : > { %930 = vmatprep.subr.bf16.mxu0 %v929_v63 }
  0x28   : > { %828 = vmatmul.mubr.f32.vlgmr.msra.gmra.mrb[0].mxu0 %v267_v3  ;;  %896 = vmatpush3.bf16.msra.mxu1 %v893_v2 }
  0x29   : > { %932 = vmatpush3.bf16.msra.mxu0 %v929_v63  ;;  %862 = vmatprep.mubr.f32.mxu0 %v453_v5 }
  0x2a   : > { %934 = vmatprep.subr.bf16.mxu0 %v933_v4 }
  0x2b   : > { %793 = vmatmul.mubr.f32.vlgmr.msra.gmra.mrb[0].mxu1 %v1095_v40 }
  0x2d   : > { %936 = vmatpush3.bf16.msra.mxu0 %v933_v4 }
  0x2e   : > { %938 = vmatprep.subr.bf16.mxu0 %v937_v8 }
  0x31   : > { %940 = vmatpush3.bf16.msra.mxu0 %v937_v8 }
  0x32   : > { %942 = vmatprep.subr.bf16.mxu0 %v941_v11 }
  0x35   : > { %944 = vmatpush3.bf16.msra.mxu0 %v941_v11 }
  0x36   : > { %946 = vmatprep.subr.bf16.mxu0 %v945_v14 }
  0x39   : > { %948 = vmatpush3.bf16.msra.mxu0 %v945_v14 }
  0x3a   : > { %950 = vmatprep.subr.bf16.mxu0 %v949_v17 }
  0x3d   : > { %952 = vmatpush3.bf16.msra.mxu0 %v949_v17 }
  0x3e   : > { %954 = vmatprep.subr.bf16.mxu0 %v953_v20 }
  0x41   : > { %956 = vmatpush3.bf16.msra.mxu0 %v953_v20 }
  0x42   : > { %958 = vmatprep.subr.bf16.mxu0 %v957_v23 }
  0x45   : > { %960 = vmatpush3.bf16.msra.mxu0 %v957_v23 }
  0x48   : > { %863 = vmatmul.mubr.f32.vlgmr.msra.gmra.mrb[0].mxu0 %v454_v24 }
  0xfe   : > { %v794_v25 = vpop.f32.mrb[0].mxu1 }
  0xff   : > { %v369_v26 = vpop.f32.mrb[1].mxu1 }
 0x11b   : > { %v864_v27 = vpop.f32.mrb[0].mxu0 }
 0x11c   : > { %v961_v28 = vadd.f32 %v864_v27, %v794_v25  ;;  %v538_v29 = vpop.f32.mrb[1].mxu0 }
 0x11d   : > { %v962_v30 = vadd.f32 %v538_v29, %v369_v26 }
 0x11e   : > { %550 = vst [vmem:[%s231_s13 + $0x8] sm:$0xff] %v961_v28  ;;  %v560_v31 = vmul.f32 %v961_v28, %v961_v28 }
 0x11f   : > { %549 = vst [vmem:[%s231_s13] sm:$0xff] %v962_v30  ;;  %v551_v32 = vadd.f32 %v962_v30, %v961_v28  ;;  %v559_v33 = vmul.f32 %v962_v30, %v962_v30 }
 0x121   : > { %v552_v34 = vrot.slane %v551_v32, 4  ;;  %v561_v35 = vadd.f32 %v560_v31, %v559_v33 }
 0x123   : > { %v553_v36 = vadd.f32 %v552_v34, %v551_v32  ;;  %v562_v37 = vrot.slane %v561_v35, 4 }
 0x125   : > { %v554_v38 = vrot.slane %v553_v36, 2  ;;  %v563_v39 = vadd.f32 %v562_v37, %v561_v35 }
 0x127   : > { %v555_v40 = vadd.f32 %v554_v38, %v553_v36  ;;  %v564_v41 = vrot.slane %v563_v39, 2 }
 0x129   : > { %v556_v42 = vrot.slane %v555_v40, 1  ;;  %v565_v43 = vadd.f32 %v564_v41, %v563_v39 }
 0x12b   : > { %v566_v44 = vrot.slane %v565_v43, 1  ;;  %v557_v45 = vadd.f32 %v556_v42, %v555_v40 }
 0x12d   : > { %v567_v46 = vadd.f32 %v566_v44, %v565_v43 }
 0x12f   : > { %v570_v47 = vsel %vm569_vm2, %v557_v45, %v567_v46 }
 0x130   : > { %571 = vst [vmem:[%s235_s16] sm:$0x3] %v570_v47 }
 0x131 PF: > { %s16_s18 = sadd.s32 1, %s980_s18  }
 0x132   : > { %p13_p4 = scmp.ge.s32.totalorder %s16_s18, 4  }
 0x134   :  { %15 = sbr.rel (!%p13_p4) target bundleno = 1 (0x1), region = 80 }

</bundles_post_ra>
